<compile_context>
chip_gen: v6e
topology: v6e:2x2x1
jax: 0.10.0
libtpu: 0.0.40
codegen_flags: <defaults>
</compile_context>

<pallas_src>
import functools

import jax
import jax.numpy as jnp
from jax import lax
from jax.experimental import pallas as pl
from jax.experimental.pallas import tpu as pltpu


def _round_up(x: int, m: int) -> int:
    return ((x + m - 1) // m) * m


def _device_defaults():
    """(tm, tn, tk, vmem_cap_bytes) tile targets for the local TPU generation."""
    kind = ""
    try:
        kind = jax.devices()[0].device_kind.lower()
    except Exception:
        pass
    if "v6" in kind:
        # v6e: 918 TF/s vs ~1.4 TB/s -> needs AI >= ~650 flop/byte; 128 MiB VMEM.
        return 1024, 1536, 512, 100 << 20
    if "v7" in kind:
        # v7x: only 64 MiB VMEM per TC -> keep footprint well under ~48 MiB.
        return 1024, 1024, 512, 48 << 20
    # v5e / unknown chips: all-generation floor (AI ~256 flop/byte), safe VMEM.
    return 512, 512, 512, 48 << 20


def _pick_tile(dim: int, target: int, align: int, min_blocks: int = 1):
    """Pick (tile, padded_dim) with tile <= target and tile | padded_dim.

    If the dim fits in one tile (and a single block is acceptable) we use the
    full extent (no padding, via the full-dim exception to the (8,128) rule).
    Otherwise the largest `align`-multiple tile dividing the aligned dim is
    chosen, so padding never exceeds align-1 elements; when min_blocks > 1 we
    additionally require padded_dim // tile >= min_blocks when possible.
    """
    if min_blocks <= 1 and dim <= target:
        return dim, dim
    dim_p = _round_up(dim, align)
    upper = max((min(target, dim_p // max(min_blocks, 1)) // align) * align, align)
    for t in range(upper, align - 1, -align):
        if dim_p % t == 0 and dim_p // t >= min_blocks:
            return t, dim_p
    return align, dim_p


def _shrink_targets(tm, tn, tk, itx, itw, ito, extra_acc, cap):
    """Shrink tile targets until the double-buffered footprint fits the cap."""
    def footprint(a, b, c):
        f = 2 * (a * c * itx + b * c * itw) + 2 * a * b * ito
        if extra_acc:
            f += a * b * 4
        return f
    while footprint(tm, tn, tk) > int(0.85 * cap):
        if tk >= max(tm, tn) and tk > 128:
            tk //= 2
        elif tn >= tm and tn > 128:
            tn //= 2
        elif tm > 128:
            tm //= 2
        else:
            break
    return tm, tn, tk


def _make_linear_kernel(has_bias: bool, acc_is_out: bool):
    """Kernel for one (tm, tn) output tile; grid axis 2 is the K reduction."""

    def kernel(*refs):
        idx = 0
        x_ref = refs[idx]; idx += 1          # (tm, tk)
        w_ref = refs[idx]; idx += 1          # (tn, tk)  native (N, K) layout
        b_ref = None
        if has_bias:
            b_ref = refs[idx]; idx += 1      # (1, tn)
        o_ref = refs[idx]; idx += 1          # (tm, tn)
        acc_ref = o_ref if acc_is_out else refs[idx]

        k = pl.program_id(2)

        @pl.when(k == 0)
        def _():
            # Fold the bias into the accumulator init: no epilogue RMW needed.
            if has_bias:
                acc_ref[...] = jnp.broadcast_to(
                    b_ref[...].astype(jnp.float32), acc_ref.shape)
            else:
                acc_ref[...] = jnp.zeros(acc_ref.shape, dtype=acc_ref.dtype)

        # NT contraction over K (contract dim 1 of both operands) -- MXU
        # native (same pattern as flash-attention q.k^T); keeps the weight in
        # its HBM-native (N, K) layout with no wrapper-side transpose pass.
        acc_ref[...] += lax.dot_general(
            x_ref[...], w_ref[...],
            dimension_numbers=(((1,), (1,)), ((), ())),
            preferred_element_type=jnp.float32,
        )

        if not acc_is_out:
            @pl.when(k == pl.num_programs(2) - 1)
            def _():
                o_ref[...] = acc_ref[...].astype(o_ref.dtype)

    return kernel


@functools.partial(jax.jit,
                   static_argnames=("tm", "tn", "tk", "compute_dtype"))
def column_parallel_linear(x, weight, bias=None, *, tm=None, tn=None, tk=None,
                           compute_dtype=None):
    """y = x @ weight.T + bias  (F.linear semantics, tp_size == 1).

    x:      (..., input_size)
    weight: (output_size, input_size)   -- used in its native (N, K) layout
    bias:   (output_size,) or None
    compute_dtype: optionally cast x / W (e.g. to bf16) for the MXU while
      keeping f32 accumulation and the original output dtype.  None = exact
      input dtypes (matches F.linear).
    """
    N, K = weight.shape
    orig_lead = x.shape[:-1]
    out_dtype = x.dtype

    x2 = x.reshape(-1, K)
    M = x2.shape[0]

    if compute_dtype is not None:
        compute_dtype = jnp.dtype(compute_dtype)
        x2 = x2.astype(compute_dtype)
        weight = weight.astype(compute_dtype)

    has_bias = bias is not None
    acc_is_out = out_dtype == jnp.float32

    dtm, dtn, dtk, vmem_cap = _device_defaults()
    tm = dtm if tm is None else tm
    tn = dtn if tn is None else tn
    tk = dtk if tk is None else tk

    itx = jnp.dtype(x2.dtype).itemsize
    itw = jnp.dtype(weight.dtype).itemsize
    ito = jnp.dtype(out_dtype).itemsize
    itb = jnp.dtype(bias.dtype).itemsize if has_bias else 0

    tm, tn, tk = _shrink_targets(tm, tn, tk, itx, itw, ito,
                                 not acc_is_out, vmem_cap)

    # Dtype-aware sublane alignment for the M axis (8 f32 / 16 bf16 / 32 i8).
    m_align = max(8, 32 // min(itx, ito))
    tm, Mp = _pick_tile(M, tm, m_align)
    # Single M block (decode-size M): force >= 2 N blocks so both TensorCores
    # (v7x) / megacore halves get work.
    n_min_blocks = 2 if (Mp // tm == 1 and N >= 256) else 1
    tn, Np = _pick_tile(N, tn, 128, n_min_blocks)
    tk, Kp = _pick_tile(K, tk, 128)

    # Pad only when alignment requires it (< m_align / < 128 extra elements).
    # NOTE: the weight is static across calls; in production pad/cast it once
    # outside the hot path and pass the pre-padded array so this is a no-op
    # (it already is whenever N and K are 128-aligned).
    x2p = x2 if (Mp == M and Kp == K) else jnp.pad(x2, ((0, Mp - M), (0, Kp - K)))
    wp = weight if (Np == N and Kp == K) else jnp.pad(
        weight, ((0, Np - N), (0, Kp - K)))

    grid = (Mp // tm, Np // tn, Kp // tk)

    in_specs = [
        pl.BlockSpec((tm, tk), lambda i, j, k: (i, k)),   # x
        pl.BlockSpec((tn, tk), lambda i, j, k: (j, k)),   # W, native (N, K)
    ]
    args = [x2p, wp]
    if has_bias:
        bp = bias if Np == N else jnp.pad(bias, (0, Np - N))
        args.append(bp.reshape(1, Np))
        in_specs.append(pl.BlockSpec((1, tn), lambda i, j, k: (0, j)))

    scratch_shapes = [] if acc_is_out else [pltpu.VMEM((tm, tn), jnp.float32)]

    # VMEM budget: the estimate already counts double-buffering, so no extra
    # fudge; just leave fixed headroom for Mosaic internal scratch and stay
    # under the per-generation cap (48 MiB keeps v7x's 64 MiB/TC safe).
    vmem_need = 2 * (tm * tk * itx + tn * tk * itw) + 2 * tm * tn * ito
    if has_bias:
        vmem_need += 2 * tn * itb
    if not acc_is_out:
        vmem_need += tm * tn * 4
    vmem_limit = int(min(max(vmem_need + (8 << 20), 32 << 20), vmem_cap))

    gi, gj, gk = grid
    bytes_accessed = (gj * Mp * Kp * itx        # x streamed once per N block
                      + gi * Np * Kp * itw      # W streamed once per M block
                      + Mp * Np * ito)          # output written once
    if has_bias:
        bytes_accessed += gi * Np * itb
    cost = pl.CostEstimate(flops=2 * Mp * Np * Kp, transcendentals=0,
                           bytes_accessed=int(bytes_accessed))

    out = pl.pallas_call(
        _make_linear_kernel(has_bias, acc_is_out),
        out_shape=jax.ShapeDtypeStruct((Mp, Np), out_dtype),
        grid_spec=pltpu.PrefetchScalarGridSpec(
            num_scalar_prefetch=0,
            grid=grid,
            in_specs=in_specs,
            out_specs=pl.BlockSpec((tm, tn), lambda i, j, k: (i, j)),
            scratch_shapes=scratch_shapes,
        ),
        compiler_params=pltpu.CompilerParams(
            dimension_semantics=("parallel", "parallel", "arbitrary"),
            vmem_limit_bytes=vmem_limit,
        ),
        cost_estimate=cost,
    )(*args)

    if Mp != M or Np != N:
        out = out[:M, :N]
    return out.reshape(*orig_lead, N)


if __name__ == "__main__":
    # Deterministic synthetic parameters & inputs (no checkpoint loading).
    key = jax.random.PRNGKey(0)
    kx, kw, kb, kx2, kw2, kb2 = jax.random.split(key, 6)

    # --- small case matching the module defaults ---------------------------
    input_size, output_size = 32, 64
    batch, seq = 2, 8
    x = jax.random.normal(kx, (batch, seq, input_size), dtype=jnp.float32)
    weight = jax.random.normal(kw, (output_size, input_size),
                               dtype=jnp.float32) / jnp.sqrt(input_size)
    bias = jax.random.normal(kb, (output_size,), dtype=jnp.float32)

    y = jax.block_until_ready(column_parallel_linear(x, weight, bias))
    y_ref = jnp.einsum("bsk,nk->bsn", x, weight, precision="highest") + bias
    assert y.shape == (batch, seq, output_size)
    assert jnp.allclose(y, y_ref, atol=1e-4, rtol=1e-4)

    # bias=False case (module default)
    y_nb = jax.block_until_ready(column_parallel_linear(x, weight, None))
    y_nb_ref = jnp.einsum("bsk,nk->bsn", x, weight, precision="highest")
    assert jnp.allclose(y_nb, y_nb_ref, atol=1e-4, rtol=1e-4)

    # --- moderate case: multi-tile N (>=2 blocks) + explicit K reduction ---
    K2, N2, B2, S2 = 384, 512, 2, 160
    x2 = jax.random.normal(kx2, (B2, S2, K2), dtype=jnp.float32)
    w2 = jax.random.normal(kw2, (N2, K2), dtype=jnp.float32) / jnp.sqrt(K2)
    b2 = jax.random.normal(kb2, (N2,), dtype=jnp.float32)

    y2 = jax.block_until_ready(column_parallel_linear(x2, w2, b2, tk=128))
    y2_ref = jnp.einsum("bsk,nk->bsn", x2, w2, precision="highest") + b2
    assert y2.shape == (B2, S2, N2)
    assert jnp.allclose(y2, y2_ref, atol=2e-3, rtol=2e-3)

    # f32 inputs with bf16 MXU compute (f32 accumulation, f32 output dtype)
    y2c = jax.block_until_ready(
        column_parallel_linear(x2, w2, b2, compute_dtype=jnp.bfloat16))
    assert y2c.dtype == jnp.float32
    assert jnp.allclose(y2c, y2_ref, atol=5e-2, rtol=5e-2)

    # --- bf16 case: exercises the f32-scratch-accumulator path -------------
    xb = x2.astype(jnp.bfloat16)
    wb = w2.astype(jnp.bfloat16)
    bb = b2.astype(jnp.bfloat16)
    yb = jax.block_until_ready(column_parallel_linear(xb, wb, bb))
    yb_ref = (jnp.einsum("bsk,nk->bsn", xb.astype(jnp.float32),
                         wb.astype(jnp.float32), precision="highest")
              + bb.astype(jnp.float32))
    assert yb.dtype == jnp.bfloat16
    assert jnp.allclose(yb.astype(jnp.float32), yb_ref, atol=5e-2, rtol=5e-2)

    print("KERNEL_OK")
</pallas_src>

<mosaic_0001>
module attributes {stable_mosaic.version = 11 : i64} {
  func.func @kernel(%arg0: i32, %arg1: i32, %arg2: i32, %arg3: memref<16x32xf32, #tpu.memory_space<vmem>>, %arg4: memref<64x32xf32, #tpu.memory_space<vmem>>, %arg5: memref<1x64xf32, #tpu.memory_space<vmem>>, %arg6: memref<16x64xf32, #tpu.memory_space<vmem>>) attributes {dimension_semantics = [#tpu.dimension_semantics<parallel>, #tpu.dimension_semantics<parallel>, #tpu.dimension_semantics<arbitrary>], iteration_bounds = array<i64: 1, 1, 1>, scalar_prefetch = 0 : i64, scratch_operands = 0 : i64, tpu.core_type = #tpu.core_type<tc>, window_params = [{transform_indices = @transform_0, window_bounds = array<i64: 16, 32>}, {transform_indices = @transform_1, window_bounds = array<i64: 64, 32>}, {transform_indices = @transform_2, window_bounds = array<i64: 1, 64>}, {transform_indices = @transform_3, window_bounds = array<i64: 16, 64>}]} {
    %c0_i32 = arith.constant 0 : i32
    %0 = arith.cmpi eq, %arg2, %c0_i32 : i32
    %1 = arith.extui %0 : i1 to i32
    %c0_i32_0 = arith.constant 0 : i32
    %2 = arith.cmpi ne, %1, %c0_i32_0 : i32
    scf.if %2 {
      %c0_8 = arith.constant 0 : index
      %c0_9 = arith.constant 0 : index
      %9 = vector.load %arg5[%c0_8, %c0_9] : memref<1x64xf32, #tpu.memory_space<vmem>>, vector<1x64xf32>
      %10 = vector.shape_cast %9 : vector<1x64xf32> to vector<1x64xf32>
      %11 = vector.broadcast %10 : vector<1x64xf32> to vector<16x64xf32>
      %c0_10 = arith.constant 0 : index
      %c0_11 = arith.constant 0 : index
      %12 = vector.load %arg6[%c0_10, %c0_11] : memref<16x64xf32, #tpu.memory_space<vmem>>, vector<16x64xf32>
      tpu.vector_store %arg6[%c0_10, %c0_11], %11 {strides = array<i32>} : memref<16x64xf32, #tpu.memory_space<vmem>>, vector<16x64xf32>,
    } else {
    }
    %c0 = arith.constant 0 : index
    %c0_1 = arith.constant 0 : index
    %3 = vector.load %arg6[%c0, %c0_1] : memref<16x64xf32, #tpu.memory_space<vmem>>, vector<16x64xf32>
    %c0_2 = arith.constant 0 : index
    %c0_3 = arith.constant 0 : index
    %4 = vector.load %arg3[%c0_2, %c0_3] : memref<16x32xf32, #tpu.memory_space<vmem>>, vector<16x32xf32>
    %c0_4 = arith.constant 0 : index
    %c0_5 = arith.constant 0 : index
    %5 = vector.load %arg4[%c0_4, %c0_5] : memref<64x32xf32, #tpu.memory_space<vmem>>, vector<64x32xf32>
    %cst = arith.constant dense<0.000000e+00> : vector<16x64xf32>
    %6 = tpu.matmul %4, %5, %cst {dimension_numbers = #tpu.dot_dimension_numbers<[1], [1], [0], [0], [0, 0, 1, 0], [], []>} : vector<16x32xf32>, vector<64x32xf32>, vector<16x64xf32> -> vector<16x64xf32>
    %7 = arith.addf %3, %6 : vector<16x64xf32>
    %c0_6 = arith.constant 0 : index
    %c0_7 = arith.constant 0 : index
    %8 = vector.load %arg6[%c0_6, %c0_7] : memref<16x64xf32, #tpu.memory_space<vmem>>, vector<16x64xf32>
    tpu.vector_store %arg6[%c0_6, %c0_7], %7 {strides = array<i32>} : memref<16x64xf32, #tpu.memory_space<vmem>>, vector<16x64xf32>,
    return
  }
  func.func @transform_0(%arg0: i32, %arg1: i32, %arg2: i32) -> (i32, i32) {
    %c0_i32 = arith.constant 0 : i32
    return %arg0, %arg2 : i32, i32
  }
  func.func @transform_1(%arg0: i32, %arg1: i32, %arg2: i32) -> (i32, i32) {
    %c0_i32 = arith.constant 0 : i32
    return %arg1, %arg2 : i32, i32
  }
  func.func @transform_2(%arg0: i32, %arg1: i32, %arg2: i32) -> (i32, i32) {
    %c0_i32 = arith.constant 0 : i32
    %c0_i32_0 = arith.constant 0 : i32
    return %c0_i32, %arg1 : i32, i32
  }
  func.func @transform_3(%arg0: i32, %arg1: i32, %arg2: i32) -> (i32, i32) {
    %c0_i32 = arith.constant 0 : i32
    return %arg0, %arg1 : i32, i32
  }
}

</mosaic_0001>

<bundles_post_ra>
// kernel: column_parallel_linear.1
= control target key start
LH: loop header
LB: loop body
LE: loop exit
PB: predicated region body
PF: predicated region fallthrough
CT: control target
= control target key end

     0   :  { %vm41_vm0 = vcmask 261120   ;;  %vm26_vm1 = vcmask 523264   ;;  %s314_s0 = inlined_call_operand.vmem [shape: f32[16,32], index: 0, kind: input, shape index: {}]   ;;  %s315_s1 = inlined_call_operand.vmem [shape: f32[64,32], index: 1, kind: input, shape index: {}]   ;;  %s316_s2 = inlined_call_operand.vmem [shape: f32[1,64], index: 2, kind: input, shape index: {}]   ;;  %s317_s3 = inlined_call_operand.hbm [shape: f32[16,64], index: 3, kind: output, shape index: {}]  }
   0x1   :  { %v40_v0 = vld [vmem:[%s315_s1 + $0x38] sm:$0xff]  ;;  %v39_v1 = vld [vmem:[%s315_s1 + $0x30] sm:$0xff]  ;;  %v31_v2 = vld [vmem:[%s314_s0] sm:$0xff] }
   0x2   :  { %189 = vmatprep.subr.msk.mxu0 %vm41_vm0, %v40_v0  ;;  %205 = vmatprep.mubr.msk.f32.mxu0 %vm41_vm0, %v31_v2  ;;  %v168_v3 = vld [vmem:[%s316_s2] ss:$0 sm:$0xff] }
   0x3   :  { %190 = vmatpush3.xpose.msk.msra.mxu0 %vm41_vm0, %v40_v0 }
   0x4   :  { %191 = vmatprep.subr.msk.mxu0 %vm41_vm0, %v39_v1 }
   0x5   :  { %8 = vsyncpa [#allocation3], 0  ;;  %v38_v4 = vld [vmem:[%s315_s1 + $0x28] sm:$0xff]  ;;  %28 = vst.msk [vmem:[#allocation2 + $0x8] sm:$0xff] %vm26_vm1, %v168_v3  ;;  %v37_v5 = vld [vmem:[%s315_s1 + $0x20] sm:$0xff]  ;;  %s233_s6 = smov [#allocation2]  }
   0x6   :  { %27 = vst.msk [vmem:[#allocation2] sm:$0xff] %vm26_vm1, %v168_v3  ;;  %v36_v6 = vld [vmem:[%s315_s1 + $0x18] sm:$0xff]  ;;  %v35_v7 = vld [vmem:[%s315_s1 + $0x10] sm:$0xff]  ;;  %v34_v8 = vld [vmem:[%s315_s1 + $0x8] sm:$0xff]  ;;  %s157_s7 = sshll.u32 %s233_s6, 4  ;;  %s158_s7 = int_to_ptr.vmem [resolvable:$true] %s157_s7 }
   0x7   :  { %192 = vmatpush3.xpose.msk.msra.mxu0 %vm41_vm0, %v39_v1  ;;  %v33_v9 = vld [vmem:[%s315_s1] sm:$0xff]  ;;  %v32_v10 = vld [vmem:[%s314_s0 + $0x8] sm:$0xff]  ;;  %s211_s1 = scalar_lea.vmem %s158_s7, 256  ;;  %p216_p1 = scmp.lt.s32.totalorder %s158_s7, %s158_s7 }
   0x8   :  { %193 = vmatprep.subr.msk.mxu0 %vm41_vm0, %v38_v4  ;;  %p212_p0 = scmp.ne.s32.totalorder %s158_s7, %s211_s1  ;;  %p217_p2 = scmp.lt.s32.totalorder %s211_s1, %s211_s1 }
   0xa   :  { %p218_p3 = por %p217_p2, %p216_p1 }
   0xb   :  { %194 = vmatpush3.xpose.msk.msra.mxu0 %vm41_vm0, %v38_v4 }
   0xc   :  { %195 = vmatprep.subr.msk.mxu0 %vm41_vm0, %v37_v5  ;;  %v30_v11 = vld [vmem:[#allocation2 + $0x8] sm:$0xff]  ;;  %p219_p4 = pnand %p218_p3, %p212_p0 }
   0xd   :  { %v29_v13 = vld [vmem:[#allocation2] sm:$0xff] }
   0xf   :  { %196 = vmatpush3.xpose.msk.msra.mxu0 %vm41_vm0, %v37_v5 }
  0x10   :  { %197 = vmatprep.subr.msk.mxu0 %vm41_vm0, %v36_v6 }
  0x13   :  { %198 = vmatpush3.xpose.msk.msra.mxu0 %vm41_vm0, %v36_v6 }
  0x14   :  { %199 = vmatprep.subr.msk.mxu0 %vm41_vm0, %v35_v7 }
  0x17   :  { %200 = vmatpush3.xpose.msk.msra.mxu0 %vm41_vm0, %v35_v7 }
  0x18   :  { %201 = vmatprep.subr.msk.mxu0 %vm41_vm0, %v34_v8 }
  0x1b   :  { %202 = vmatpush3.xpose.msk.msra.mxu0 %vm41_vm0, %v34_v8 }
  0x1c   :  { %203 = vmatprep.subr.msk.mxu0 %vm41_vm0, %v33_v9 }
  0x1f   :  { %204 = vmatpush3.xpose.msk.msra.mxu0 %vm41_vm0, %v33_v9 }
  0x22   :  { %206 = vmatmul.mubr.msk.f32.vlgmr.msra.gmra.mxu0 %vm41_vm0, %v32_v10 }
  0xe2   :  { %v207_v12 = vpop.f32.mrf.mxu0 }
  0xe3   :  { %v148_v14 = vadd.f32 %v207_v12, %v30_v11 }
  0xe4   :  { %v138_v15 = vpop.f32.mrf.mxu0 }
  0xe5   :  { %151 = vst.msk [vmem:[#allocation2 + $0x8] sm:$0xff] %vm26_vm1, %v148_v14  ;;  %v147_v16 = vadd.f32 %v138_v15, %v29_v13 }
  0xe7   :  { %150 = vst.msk [vmem:[#allocation2] sm:$0xff] %vm26_vm1, %v147_v16 }
  0xe8   :  { %222 = shalt.err (!%p219_p4)
}
  0xe9   :  { %s234_s0 = smov 128   ;;  %s235_s8 = smov 8  }
  0xea   :  { %163 = dma.vmem_to_hbm [thread:$0]  %s158_s7, 256, %s317_s3, [#allocation3], %s234_s0, %s234_s0, %s235_s8  }
  0xeb   :  { %231 = dma.done.wait [#allocation3], 256  }
  0xec   :  { %232 = vsyncadd [#allocation3], 4294967040 }
  0xed   :  { %167 = vsyncpa [#allocation3], 1 }

</bundles_post_ra>
